<compile_context>
chip_gen: v7x
topology: tpu7x:2x2x1
jax: 0.10.0
libtpu: 0.0.40
codegen_flags: <defaults>
</compile_context>

<pallas_src>
import functools

import jax
import jax.numpy as jnp
from jax.experimental import pallas as pl
from jax.experimental.pallas import tpu as pltpu


def _vmem_limit_bytes():
    """Generation-aware scoped-VMEM budget.

    32 MiB is safe on every current generation (v5e/v6e: 128 MiB physical,
    v7x: 64 MiB physical) and above v5e's 16 MiB default scoped limit.
    If the runtime exposes the real capacity, use half of it (<= 48 MiB).
    """
    limit = 32 * 1024 * 1024
    try:
        info = pltpu.get_tpu_info()
        cap = getattr(info, "vmem_capacity_bytes", None)
        if cap:
            limit = max(min(int(cap) // 2, 48 * 1024 * 1024), 16 * 1024 * 1024)
    except Exception:
        pass
    return limit


def _pick_tile_m(M, K, embed_dim, compute_itemsize, out_itemsize,
                 tile_m, vmem_limit):
    """Largest M tile that fits the VMEM budget; prefer a divisor of M."""
    # Weight + bias stay resident but are still double-buffered by the pipeline.
    resident = 2 * (K * embed_dim * compute_itemsize + embed_dim * 4)
    # Streaming, double-buffered bytes per output row: patches + output tiles.
    per_row = 2 * (K * compute_itemsize + embed_dim * out_itemsize)
    budget = int(vmem_limit * 0.75)          # headroom for compiler scratch
    fit = max((budget - resident) // per_row, 8)
    cap = min(tile_m, fit)
    if M <= cap:
        return M                             # single full-extent block (legal)
    cap = max((cap // 8) * 8, 8)             # tiled dim must be sublane-aligned
    for tm in range(cap, 7, -8):             # prefer a divisor -> no ragged tail
        if M % tm == 0:
            return tm
    return cap                               # ragged tail: Pallas masks last block


def _patch_embed_kernel(x_ref, w_ref, b_ref, o_ref):
    # x_ref: (TM, K) bf16 patches, w_ref: (K, E) bf16 weights,
    # b_ref: (1, E) f32 bias, o_ref: (TM, E) output.
    acc = jnp.dot(x_ref[...], w_ref[...], preferred_element_type=jnp.float32)
    o_ref[...] = (acc + b_ref[...]).astype(o_ref.dtype)


@functools.partial(jax.jit, static_argnames=("patch_size", "tile_m", "compute_dtype"))
def patch_embed_forward(x, weight, bias, patch_size,
                        tile_m=8192, compute_dtype=jnp.bfloat16):
    """x: (b, c, H, W); weight: (embed_dim, c, ph, pw); bias: (embed_dim,).

    Returns (b, num_patches, embed_dim), identical to
    Conv2d(stride=kernel=patch).flatten(2,-1).transpose(1,2).
    """
    b, c, H, W = x.shape
    ph, pw = patch_size
    Hp, Wp = H // ph, W // pw
    L = Hp * Wp
    E = weight.shape[0]
    K = c * ph * pw
    M = b * L
    out_dtype = x.dtype
    compute_itemsize = jnp.dtype(compute_dtype).itemsize
    out_itemsize = jnp.dtype(out_dtype).itemsize

    vmem_limit = _vmem_limit_bytes()
    tm = _pick_tile_m(M, K, E, compute_itemsize, out_itemsize, tile_m, vmem_limit)
    grid = (pl.cdiv(M, tm),)

    # Patchify: (b, c, H, W) -> (b, Hp, Wp, c, ph, pw) -> (M, K).
    # Per-patch flatten order (c, ph, pw) matches the conv weight layout.
    # TODO(synk): read NCHW blocks directly in-kernel (grid over (b, Hp) with a
    # rectangular x BlockSpec + in-VMEM relayout) to remove this HBM round
    # trip; blocked on ph (=4) < 8 sublane-tiling constraints, so we keep the
    # XLA-side glue and the allow_input_fusion hint.
    patches = (
        x.reshape(b, c, Hp, ph, Wp, pw)
        .transpose(0, 2, 4, 1, 3, 5)
        .reshape(M, K)
        .astype(compute_dtype)
    )
    w_mat = weight.reshape(E, K).T.astype(compute_dtype)   # (K, E)
    b_mat = bias.reshape(1, E).astype(jnp.float32)         # (1, E)

    cost = pl.CostEstimate(
        flops=2 * M * K * E,
        transcendentals=0,
        bytes_accessed=(M * K * compute_itemsize      # patches read
                        + K * E * compute_itemsize    # weight read
                        + E * 4                       # bias read
                        + M * E * out_itemsize),      # output write (unpadded)
    )

    out = pl.pallas_call(
        _patch_embed_kernel,
        out_shape=jax.ShapeDtypeStruct((M, E), out_dtype),
        grid=grid,
        in_specs=[
            pl.BlockSpec((tm, K), lambda i: (i, 0)),   # patches: tiled over M
            pl.BlockSpec((K, E), lambda i: (0, 0)),    # weight: resident
            pl.BlockSpec((1, E), lambda i: (0, 0)),    # bias: resident
        ],
        out_specs=pl.BlockSpec((tm, E), lambda i: (i, 0)),
        compiler_params=pltpu.CompilerParams(
            dimension_semantics=("parallel",),         # shard M across TCs (v7x)
            allow_input_fusion=[True, False, False],   # try to fuse patchify DMA
            vmem_limit_bytes=vmem_limit,
        ),
        cost_estimate=cost,
    )(patches, w_mat, b_mat)

    # (M, E) -> (b, L, E); contiguous reshape, no data movement.
    return out.reshape(b, L, E)


def _reference_forward(x, weight, bias, patch_size, compute_dtype=jnp.bfloat16):
    """Pure-JAX reference (conv as einsum) with the same bf16 input cast."""
    b, c, H, W = x.shape
    ph, pw = patch_size
    Hp, Wp = H // ph, W // pw
    patches = (
        x.reshape(b, c, Hp, ph, Wp, pw)
        .transpose(0, 2, 4, 1, 3, 5)
        .reshape(b, Hp * Wp, c * ph * pw)
        .astype(compute_dtype)
    )
    w_mat = weight.reshape(weight.shape[0], -1).astype(compute_dtype)  # (E, K)
    acc = jnp.einsum("blk,ek->ble", patches, w_mat,
                     preferred_element_type=jnp.float32)
    return (acc + bias[None, None, :].astype(jnp.float32)).astype(x.dtype)


if __name__ == "__main__":
    # Small shapes consistent with the module: img 16x16, patch 4x4,
    # in_chans=4, embed_dim=32 -> num_patches = 16.
    batch, in_chans, img, patch, embed_dim = 2, 4, 16, 4, 32

    key = jax.random.PRNGKey(0)
    kx, kw, kb = jax.random.split(key, 3)
    x = jax.random.normal(kx, (batch, in_chans, img, img), dtype=jnp.float32)
    # Deterministic synthetic parameters (Conv2d weight/bias shapes).
    weight = jax.random.normal(
        kw, (embed_dim, in_chans, patch, patch), dtype=jnp.float32
    ) * 0.05
    bias = jax.random.normal(kb, (embed_dim,), dtype=jnp.float32) * 0.05

    out = patch_embed_forward(x, weight, bias, (patch, patch))
    out = jax.block_until_ready(out)

    ref = _reference_forward(x, weight, bias, (patch, patch))
    assert out.shape == (batch, (img // patch) ** 2, embed_dim), out.shape
    assert jnp.allclose(out, ref, atol=1e-2, rtol=1e-2), "mismatch vs reference"

    print("KERNEL_OK")
</pallas_src>

<mosaic_0001>
module attributes {stable_mosaic.version = 11 : i64} {
  func.func @_patch_embed_kernel(%arg0: i32, %arg1: memref<32x64xbf16, #tpu.memory_space<vmem>>, %arg2: memref<64x32xbf16, #tpu.memory_space<vmem>>, %arg3: memref<1x32xf32, #tpu.memory_space<vmem>>, %arg4: memref<32x32xf32, #tpu.memory_space<vmem>>) attributes {dimension_semantics = [#tpu.dimension_semantics<parallel>], iteration_bounds = array<i64: 1>, scalar_prefetch = 0 : i64, scratch_operands = 0 : i64, tpu.core_type = #tpu.core_type<tc>, window_params = [{transform_indices = @transform_0, window_bounds = array<i64: 32, 64>}, {pipeline_mode = #tpu.pipeline_mode<synchronous>, transform_indices = @transform_1, window_bounds = array<i64: 64, 32>}, {pipeline_mode = #tpu.pipeline_mode<synchronous>, transform_indices = @transform_2, window_bounds = array<i64: 1, 32>}, {transform_indices = @transform_3, window_bounds = array<i64: 32, 32>}]} {
    %c0 = arith.constant 0 : index
    %c0_0 = arith.constant 0 : index
    %0 = vector.load %arg1[%c0, %c0_0] : memref<32x64xbf16, #tpu.memory_space<vmem>>, vector<32x64xbf16>
    %c0_1 = arith.constant 0 : index
    %c0_2 = arith.constant 0 : index
    %1 = vector.load %arg2[%c0_1, %c0_2] : memref<64x32xbf16, #tpu.memory_space<vmem>>, vector<64x32xbf16>
    %cst = arith.constant dense<0.000000e+00> : vector<32x32xf32>
    %2 = tpu.matmul %0, %1, %cst {dimension_numbers = #tpu.dot_dimension_numbers<[1], [0], [0], [1], [0, 0, 1, 1], [], []>} : vector<32x64xbf16>, vector<64x32xbf16>, vector<32x32xf32> -> vector<32x32xf32>
    %c0_3 = arith.constant 0 : index
    %c0_4 = arith.constant 0 : index
    %3 = vector.load %arg3[%c0_3, %c0_4] : memref<1x32xf32, #tpu.memory_space<vmem>>, vector<1x32xf32>
    %4 = vector.broadcast %3 : vector<1x32xf32> to vector<32x32xf32>
    %5 = arith.addf %2, %4 : vector<32x32xf32>
    %c0_5 = arith.constant 0 : index
    %c0_6 = arith.constant 0 : index
    %6 = vector.load %arg4[%c0_5, %c0_6] : memref<32x32xf32, #tpu.memory_space<vmem>>, vector<32x32xf32>
    tpu.vector_store %arg4[%c0_5, %c0_6], %5 {strides = array<i32>} : memref<32x32xf32, #tpu.memory_space<vmem>>, vector<32x32xf32>,
    return
  }
  func.func @transform_0(%arg0: i32) -> (i32, i32) {
    %c0_i32 = arith.constant 0 : i32
    %c0_i32_0 = arith.constant 0 : i32
    return %arg0, %c0_i32 : i32, i32
  }
  func.func @transform_1(%arg0: i32) -> (i32, i32) {
    %c0_i32 = arith.constant 0 : i32
    %c0_i32_0 = arith.constant 0 : i32
    %c0_i32_1 = arith.constant 0 : i32
    return %c0_i32, %c0_i32_0 : i32, i32
  }
  func.func @transform_2(%arg0: i32) -> (i32, i32) {
    %c0_i32 = arith.constant 0 : i32
    %c0_i32_0 = arith.constant 0 : i32
    %c0_i32_1 = arith.constant 0 : i32
    return %c0_i32, %c0_i32_0 : i32, i32
  }
  func.func @transform_3(%arg0: i32) -> (i32, i32) {
    %c0_i32 = arith.constant 0 : i32
    %c0_i32_0 = arith.constant 0 : i32
    return %arg0, %c0_i32 : i32, i32
  }
}

</mosaic_0001>

<bundles_post_ra>
// kernel: patch_embed_forward.1
= control target key start
LH: loop header
LB: loop body
LE: loop exit
PB: predicated region body
PF: predicated region fallthrough
CT: control target
= control target key end

     0   :  { %vm69_vm0 = vcmask 523264   ;;  %s262_s0 = inlined_call_operand.vmem [shape: bf16[32,64], index: 0, kind: input, shape index: {}]   ;;  %s263_s1 = inlined_call_operand.vmem [shape: bf16[64,32], index: 1, kind: input, shape index: {}]   ;;  %s264_s2 = inlined_call_operand.vmem [shape: f32[1,32], index: 2, kind: input, shape index: {}]   ;;  %s265_s3 = inlined_call_operand.hbm [shape: f32[32,32], index: 3, kind: output, shape index: {}]  }
   0x1   :  { %v176_v0 = vld [vmem:[%s263_s1] sm:$0xff]   ;;  %v177_v1 = vld [vmem:[%s263_s1 + $0x8] sm:$0xff]   ;;  %v178_v2 = vld [vmem:[%s263_s1 + $0x10] sm:$0xff]  }
   0x2   :  { %161 = vmatprep.subr.bf16.mxu0 %v176_v0  ;;  %v180_v3 = vld [vmem:[%s262_s0] sm:$0xff]  }
   0x3   :  { %162 = vmatpush3.bf16.msra.mxu0 %v176_v0  ;;  %169 = vmatprep.mubr.msk.bf16.mxu0 %vm69_vm0, %v180_v3 }
   0x4   :  { %163 = vmatprep.subr.bf16.mxu0 %v177_v1 }
   0x5   :  { %8 = vsyncpa [#allocation3], 0  ;;  %v179_v4 = vld [vmem:[%s263_s1 + $0x18] sm:$0xff]   ;;  %v181_v5 = vld [vmem:[%s262_s0 + $0x8] sm:$0xff]   ;;  %vm125_vm1 = vcmask 261120   ;;  %s206_s26 = smov [#allocation2]  }
   0x6   :  { %v146_v6 = vld [vmem:[%s264_s2] ss:$0 sm:$0xff]  ;;  %s135_s27 = sshll.u32 %s206_s26, 4  ;;  %s136_s27 = int_to_ptr.vmem [resolvable:$true] %s135_s27 }
   0x7   :  { %164 = vmatpush3.bf16.msra.mxu0 %v177_v1  ;;  %s182_s0 = scalar_lea.vmem %s136_s27, 512  ;;  %p187_p1 = scmp.lt.s32.totalorder %s136_s27, %s136_s27 }
   0x8   :  { %165 = vmatprep.subr.bf16.mxu0 %v178_v2  ;;  %p183_p0 = scmp.ne.s32.totalorder %s136_s27, %s182_s0  ;;  %p188_p2 = scmp.lt.s32.totalorder %s182_s0, %s182_s0 }
   0xa   :  { %p189_p3 = por %p188_p2, %p187_p1 }
   0xb   :  { %166 = vmatpush3.bf16.msra.mxu0 %v178_v2 }
   0xc   :  { %167 = vmatprep.subr.bf16.mxu0 %v179_v4  ;;  %p190_p4 = pnand %p189_p3, %p183_p0 }
   0xf   :  { %168 = vmatpush3.bf16.msra.mxu0 %v179_v4 }
  0x12   :  { %170 = vmatmul.mubr.msk.bf16.vlgmr.msra.gmra.mrb[0].mxu0 %vm69_vm0, %v181_v5 }
  0xe5   :  { %v171_v7 = vpop.f32.mrb[0].mxu0 }
  0xe6   :  { %v119_v8 = vadd.f32 %v171_v7, %v146_v6  ;;  %v110_v9 = vpop.f32.mrb[1].mxu0 }
  0xe7   :  { %v111_v10 = vadd.f32 %v146_v6, %v110_v9  ;;  %v172_v11 = vpop.f32.mrb[2].mxu0 }
  0xe8   :  { %128 = vst.msk [vmem:[#allocation2 + $0x10] sm:$0xff] %vm125_vm1, %v119_v8  ;;  %v122_v12 = vadd.f32 %v172_v11, %v146_v6  ;;  %v113_v13 = vpop.f32.mrb[3].mxu0 }
  0xe9   :  { %126 = vst.msk [vmem:[#allocation2] sm:$0xff] %vm125_vm1, %v111_v10  ;;  %v114_v14 = vadd.f32 %v146_v6, %v113_v13 }
  0xea   :  { %129 = vst.msk [vmem:[#allocation2 + $0x18] sm:$0xff] %vm125_vm1, %v122_v12 }
  0xeb   :  { %127 = vst.msk [vmem:[#allocation2 + $0x8] sm:$0xff] %vm125_vm1, %v114_v14 }
  0xec   :  { %193 = shalt.err (!%p190_p4)
}
  0xed   :  { %s194_s28 = scalar_lea.hbm %s265_s3, 512 }
  0xee   :  { %p195_p5 = scmp.ne.s32.totalorder %s265_s3, %s194_s28  ;;  %p198_p6 = scmp.lt.u32.totalorder %s194_s28, %s265_s3 }
  0xf0   :  { %p200_p7 = pnand %p198_p6, %p195_p5 }
  0xf2   :  { %203 = shalt.err (!%p200_p7)
}
  0xf3   :  { %s207_s6 = smov 128   ;;  %s208_s7 = smov 8  }
  0xf4   :  { %141 = dma.vmem_to_hbm [thread:$0]  %s136_s27, 512, %s265_s3, [#allocation3], %s207_s6, %s207_s6, %s208_s7  }
  0xf5   :  { %204 = dma.done.wait [#allocation3], 512  }
  0xf6   :  { %205 = vsyncadd [#allocation3], 4294966784 }
  0xf7   :  { %145 = vsyncpa [#allocation3], 1 }

</bundles_post_ra>
